<compile_context>
chip_gen: v7x
topology: tpu7x:2x2x1
jax: 0.10.0
libtpu: 0.0.40
codegen_flags: <defaults>
</compile_context>

<pallas_src>
import jax
import jax.numpy as jnp
from jax.experimental import pallas as pl
from jax.experimental.pallas import tpu as pltpu


def _round_up(x, m):
    return (x + m - 1) // m * m


def _embed_kernel(ids_ref, table_ref, out_ref):
    # ids_ref   : (T, 1)       int32  -- global token ids for this tile
    # table_ref : (Vc, D)      f32    -- current vocab chunk (resident in VMEM)
    # out_ref   : (T, D)       f32    -- output tile (resident across vocab axis)
    v = pl.program_id(1)

    @pl.when(v == 0)
    def _():
        out_ref[...] = jnp.zeros_like(out_ref)

    ids = ids_ref[...]                       # (T, 1) int32
    t = ids.shape[0]
    v_chunk = table_ref.shape[0]

    # Local index of each token within this vocab chunk; out-of-chunk tokens
    # simply produce an all-zero one-hot row.
    local = ids - v * v_chunk                # (T, 1)
    onehot = (local == jax.lax.broadcasted_iota(jnp.int32, (t, v_chunk), 1)
              ).astype(table_ref.dtype)      # (T, Vc)

    out_ref[...] += jnp.dot(
        onehot, table_ref[...],
        precision=jax.lax.Precision.HIGHEST,
        preferred_element_type=jnp.float32,
    ).astype(out_ref.dtype)


def embedder_forward(ids, table, *, token_tile=128,
                     table_vmem_budget=8 * 1024 * 1024):
    """Pallas equivalent of nn.Embedding(vocab_size, d_model)(ids).

    ids   : int array of any shape
    table : (vocab_size, d_model) float32
    returns: ids.shape + (d_model,) float32
    """
    vocab_size, d_model = table.shape
    orig_shape = ids.shape

    flat_ids = ids.reshape(-1).astype(jnp.int32)
    # Bounds safety: out-of-range ids would otherwise gather garbage.
    flat_ids = jnp.clip(flat_ids, 0, vocab_size - 1)
    n_tok = flat_ids.shape[0]

    # Token tile: >= 8 sublanes (dense stores), <= token_tile to bound VMEM.
    t = min(token_tile, _round_up(max(n_tok, 1), 8))
    n_pad = _round_up(n_tok, t)
    if n_pad != n_tok:
        flat_ids = jnp.pad(flat_ids, (0, n_pad - n_tok))
    ids2d = flat_ids.reshape(n_pad, 1)

    # Vocab chunking: whole table resident in VMEM when it fits the budget,
    # otherwise split the vocab axis and accumulate partial one-hot matmuls.
    bytes_per_row = d_model * table.dtype.itemsize
    rows_fit = max(8, (table_vmem_budget // bytes_per_row) // 8 * 8)
    if vocab_size <= rows_fit:
        v_chunk = vocab_size
        table_p = table
    else:
        v_chunk = rows_fit
        v_pad = _round_up(vocab_size, v_chunk)
        table_p = jnp.pad(table, ((0, v_pad - vocab_size), (0, 0)))
    n_vchunks = table_p.shape[0] // v_chunk

    grid = (n_pad // t, n_vchunks)

    grid_spec = pltpu.PrefetchScalarGridSpec(
        num_scalar_prefetch=0,
        grid=grid,
        in_specs=[
            # Token ids for this tile.
            pl.BlockSpec((t, 1), lambda i, v: (i, 0)),
            # Table chunk: same block index for every token tile -> DMA'd once
            # per chunk and kept resident in VMEM.
            pl.BlockSpec((v_chunk, d_model), lambda i, v: (v, 0)),
        ],
        out_specs=pl.BlockSpec((t, d_model), lambda i, v: (i, 0)),
    )

    out_flat = pl.pallas_call(
        _embed_kernel,
        out_shape=jax.ShapeDtypeStruct((n_pad, d_model), table.dtype),
        grid_spec=grid_spec,
        compiler_params=pltpu.CompilerParams(
            dimension_semantics=("parallel", "arbitrary")),
    )(ids2d, table_p)

    return out_flat[:n_tok].reshape(orig_shape + (d_model,))


class Embedder:
    """Mirror of the PyTorch Embedder module (forward only)."""

    def __init__(self, vocab_size, d_model, key):
        self.d_model = d_model
        # nn.Embedding default init: weight ~ N(0, 1)
        self.weight = jax.random.normal(key, (vocab_size, d_model),
                                        dtype=jnp.float32)

    def __call__(self, x):
        return embedder_forward(x, self.weight)


if __name__ == "__main__":
    key = jax.random.PRNGKey(0)
    k_w, k_ids = jax.random.split(key)

    vocab_size = 64
    d_model = 128
    batch, seq = 2, 8

    embedder = Embedder(vocab_size, d_model, k_w)
    ids = jax.random.randint(k_ids, (batch, seq), 0, vocab_size,
                             dtype=jnp.int32)

    out = jax.block_until_ready(embedder(ids))

    # Correctness check against the plain-JAX reference (== torch embedding).
    ref = embedder.weight[ids]
    assert out.shape == (batch, seq, d_model)
    assert jnp.allclose(out, ref, rtol=1e-5, atol=1e-5), \
        "mismatch vs reference gather"

    print("KERNEL_OK")
</pallas_src>

<mosaic_0001>
module attributes {stable_mosaic.version = 11 : i64} {
  func.func @_embed_kernel(%arg0: i32, %arg1: i32, %arg2: memref<16x1xi32, #tpu.memory_space<vmem>>, %arg3: memref<64x128xf32, #tpu.memory_space<vmem>>, %arg4: memref<16x128xf32, #tpu.memory_space<vmem>>) attributes {dimension_semantics = [#tpu.dimension_semantics<parallel>, #tpu.dimension_semantics<arbitrary>], iteration_bounds = array<i64: 1, 1>, scalar_prefetch = 0 : i64, scratch_operands = 0 : i64, tpu.core_type = #tpu.core_type<tc>, window_params = [{transform_indices = @transform_0, window_bounds = array<i64: 16, 1>}, {transform_indices = @transform_1, window_bounds = array<i64: 64, 128>}, {transform_indices = @transform_2, window_bounds = array<i64: 16, 128>}]} {
    %c0_i32 = arith.constant 0 : i32
    %0 = arith.cmpi eq, %arg1, %c0_i32 : i32
    %1 = arith.extui %0 : i1 to i32
    %c0_i32_0 = arith.constant 0 : i32
    %2 = arith.cmpi ne, %1, %c0_i32_0 : i32
    scf.if %2 {
      %cst_8 = arith.constant 0.000000e+00 : f32
      %17 = vector.broadcast %cst_8 : f32 to vector<16x128xf32>
      %c0_9 = arith.constant 0 : index
      %c0_10 = arith.constant 0 : index
      %18 = vector.load %arg4[%c0_9, %c0_10] : memref<16x128xf32, #tpu.memory_space<vmem>>, vector<16x128xf32>
      tpu.vector_store %arg4[%c0_9, %c0_10], %17 {strides = array<i32>} : memref<16x128xf32, #tpu.memory_space<vmem>>, vector<16x128xf32>,
    } else {
    }
    %c0 = arith.constant 0 : index
    %c0_1 = arith.constant 0 : index
    %3 = vector.load %arg2[%c0, %c0_1] : memref<16x1xi32, #tpu.memory_space<vmem>>, vector<16x1xi32>
    %c64_i32 = arith.constant 64 : i32
    %4 = arith.muli %arg1, %c64_i32 : i32
    %5 = vector.broadcast %4 : i32 to vector<16x1xi32>
    %6 = arith.subi %3, %5 : vector<16x1xi32>
    %7 = tpu.iota {dimensions = array<i32: 1>} : vector<16x64xi32>
    %8 = vector.broadcast %6 : vector<16x1xi32> to vector<16x64xi32>
    %9 = arith.cmpi eq, %8, %7 : vector<16x64xi32>
    %10 = arith.extui %9 : vector<16x64xi1> to vector<16x64xi32>
    %11 = arith.sitofp %10 : vector<16x64xi32> to vector<16x64xf32>
    %c0_2 = arith.constant 0 : index
    %c0_3 = arith.constant 0 : index
    %12 = vector.load %arg4[%c0_2, %c0_3] : memref<16x128xf32, #tpu.memory_space<vmem>>, vector<16x128xf32>
    %c0_4 = arith.constant 0 : index
    %c0_5 = arith.constant 0 : index
    %13 = vector.load %arg3[%c0_4, %c0_5] : memref<64x128xf32, #tpu.memory_space<vmem>>, vector<64x128xf32>
    %cst = arith.constant dense<0.000000e+00> : vector<16x128xf32>
    %14 = tpu.matmul %11, %13, %cst {dimension_numbers = #tpu.dot_dimension_numbers<[1], [0], [0], [1], [0, 0, 1, 1], [], []>, precision = #tpu.contract_precision<fp32>} : vector<16x64xf32>, vector<64x128xf32>, vector<16x128xf32> -> vector<16x128xf32>
    %15 = arith.addf %12, %14 : vector<16x128xf32>
    %c0_6 = arith.constant 0 : index
    %c0_7 = arith.constant 0 : index
    %16 = vector.load %arg4[%c0_6, %c0_7] : memref<16x128xf32, #tpu.memory_space<vmem>>, vector<16x128xf32>
    tpu.vector_store %arg4[%c0_6, %c0_7], %15 {strides = array<i32>} : memref<16x128xf32, #tpu.memory_space<vmem>>, vector<16x128xf32>,
    return
  }
  func.func @transform_0(%arg0: i32, %arg1: i32) -> (i32, i32) {
    %c0_i32 = arith.constant 0 : i32
    %c0_i32_0 = arith.constant 0 : i32
    return %arg0, %c0_i32 : i32, i32
  }
  func.func @transform_1(%arg0: i32, %arg1: i32) -> (i32, i32) {
    %c0_i32 = arith.constant 0 : i32
    %c0_i32_0 = arith.constant 0 : i32
    return %arg1, %c0_i32 : i32, i32
  }
  func.func @transform_2(%arg0: i32, %arg1: i32) -> (i32, i32) {
    %c0_i32 = arith.constant 0 : i32
    %c0_i32_0 = arith.constant 0 : i32
    return %arg0, %c0_i32 : i32, i32
  }
}

</mosaic_0001>

<bundles_post_ra>
// kernel: tpu_custom_call.1
= control target key start
LH: loop header
LB: loop body
LE: loop exit
PB: predicated region body
PF: predicated region fallthrough
CT: control target
= control target key end

     0   :  { %7 = vsyncpa [#allocation3], 0  ;;  %s1114_s0 = inlined_call_operand.vmem [shape: s32[16,1], index: 0, kind: input, shape index: {}]   ;;  %s1115_s1 = inlined_call_operand.hbm [shape: f32[64,128], index: 1, kind: input, shape index: {}]   ;;  %s1116_s2 = inlined_call_operand.hbm [shape: f32[16,128], index: 2, kind: output, shape index: {}]  }
   0x1   :  { %8 = vsyncpa [#allocation4], 0  ;;  %s1013_s9 = smov [#allocation2]   ;;  %s965_s13 = scalar_lea.hbm %s1115_s1, 1024 }
   0x2   :  { %s16_s10 = sshll.u32 %s1013_s9, 4  ;;  %p966_p0 = scmp.ne.s32.totalorder %s1115_s1, %s965_s13  ;;  %s17_s10 = int_to_ptr.vmem [resolvable:$true] %s16_s10 }
   0x3   :  { %p969_p1 = scmp.lt.u32.totalorder %s965_s13, %s1115_s1 }
   0x5   :  { %p971_p2 = pnand %p969_p1, %p966_p0 }
   0x7   :  { %974 = shalt.err (!%p971_p2)
}
   0x8   :  { %s975_s18 = scalar_lea.vmem %s17_s10, 1024  ;;  %p980_p4 = scmp.lt.s32.totalorder %s17_s10, %s17_s10 }
   0x9   :  { %p976_p3 = scmp.ne.s32.totalorder %s17_s10, %s975_s18  ;;  %p981_p5 = scmp.lt.s32.totalorder %s975_s18, %s975_s18 }
   0xb   :  { %p982_p6 = por %p981_p5, %p980_p4 }
   0xd   :  { %p983_p7 = pnand %p982_p6, %p976_p3 }
   0xf   :  { %986 = shalt.err (!%p983_p7)
}
  0x10   :  { %s1014_s19 = smov 128   ;;  %s1015_s20 = smov 8  }
  0x11   :  { %22 = dma.hbm_to_vmem [thread:$0]  %s1115_s1, 1024, %s17_s10, [#allocation3], %s1014_s19, %s1014_s19, %s1015_s20  }
  0x12   :  { %1009 = dma.done.wait [#allocation3], 1024  }
  0x13   :  { %1010 = vsyncadd [#allocation3], 4294966272  ;;  %v1016_v0 = vmov 0   ;;  %v32_v1 = vld [vmem:[%s1114_s0] sm:$0xff]  ;;  %v55_v3 = vld [vmem:[#allocation2 + $0x8] sm:$0xff]  ;;  %vm62_vm0 = vcmask 523264  }
  0x14   :  { %964 = vset.pattern.permute.xlu0 %v1016_v0  ;;  %v54_v2 = vld [vmem:[#allocation2] sm:$0xff]  ;;  %v56_v5 = vld [vmem:[#allocation2 + $0x10] sm:$0xff]  ;;  %v57_v6 = vld [vmem:[#allocation2 + $0x18] sm:$0xff]  ;;  %v73_v8 = vand.u32 4294901760, %v55_v3 }
  0x15   :  { %41 = vperm.xlu0 %964, %v32_v1   ;;  %v70_v4 = vand.u32 4294901760, %v54_v2  ;;  %v33_v7 = vld [vmem:[%s1114_s0 + $0x8] sm:$0xff]  ;;  %v76_v9 = vand.u32 4294901760, %v56_v5  ;;  %v79_v10 = vand.u32 4294901760, %v57_v6  ;;  %v58_v11 = vld [vmem:[#allocation2 + $0x20] sm:$0xff]  ;;  %v60_v17 = vld [vmem:[#allocation2 + $0x30] sm:$0xff] }
  0x16   :  { %v59_v12 = vld [vmem:[#allocation2 + $0x28] sm:$0xff]  ;;  %v82_v15 = vand.u32 4294901760, %v58_v11  ;;  %v61_v18 = vld [vmem:[#allocation2 + $0x38] sm:$0xff]  ;;  %v171_v20 = vsub.f32 %v55_v3, %v73_v8  ;;  %v88_v21 = vand.u32 4294901760, %v60_v17  ;;  %v38_v3 = vlaneseq  ;;  %s1018_s0 = smov [#allocation5]  }
  0x17   :  { %v1055_v13 = vpack.c.bf16 %v73_v8, %v70_v4  ;;  %v1057_v14 = vpack.c.bf16 %v79_v10, %v76_v9  ;;  %v85_v16 = vand.u32 4294901760, %v59_v12  ;;  %v164_v19 = vsub.f32 %v54_v2, %v70_v4  ;;  %s658_s1 = sshll.u32 %s1018_s0, 4  ;;  %s659_s1 = int_to_ptr.vmem [resolvable:$true] %s658_s1 }
  0x18   :  { %v91_v22 = vand.u32 4294901760, %v61_v18  ;;  %v172_v24 = vand.u32 4294901760, %v171_v20  ;;  %v178_v28 = vsub.f32 %v56_v5, %v76_v9  ;;  %v185_v29 = vsub.f32 %v57_v6, %v79_v10  ;;  %s987_s27 = scalar_lea.vmem %s659_s1, 256  ;;  %p992_p9 = scmp.lt.s32.totalorder %s659_s1, %s659_s1 }
  0x19   :  { %44 = vperm.xlu0 %964, %v33_v7   ;;  %901 = vmatprep.subr.bf16.mxu0 %v1055_v13  ;;  %v165_v23 = vand.u32 4294901760, %v164_v19  ;;  %v1065_v25 = vpack.c.bf16 %v85_v16, %v82_v15  ;;  %v192_v38 = vsub.f32 %v58_v11, %v82_v15  ;;  %v199_v39 = vsub.f32 %v59_v12, %v85_v16  ;;  %p988_p8 = scmp.ne.s32.totalorder %s659_s1, %s987_s27  ;;  %p993_p10 = scmp.lt.s32.totalorder %s987_s27, %s987_s27 }
  0x1a   :  { %853 = vmatprep.subr.bf16.mxu1 %v1055_v13  ;;  %903 = vmatpush3.bf16.msra.mxu0 %v1055_v13  ;;  %v173_v27 = vsub.f32 %v171_v20, %v172_v24  ;;  %v1069_v30 = vpack.c.bf16 %v91_v22, %v88_v21  ;;  %v179_v33 = vand.u32 4294901760, %v178_v28  ;;  %v186_v34 = vand.u32 4294901760, %v185_v29 }
  0x1b   :  { %855 = vmatpush3.bf16.msra.mxu1 %v1055_v13  ;;  %905 = vmatprep.subr.bf16.mxu0 %v1057_v14  ;;  %v166_v26 = vsub.f32 %v164_v19, %v165_v23  ;;  %v916_v40 = vpack.c.bf16 %v172_v24, %v165_v23  ;;  %v193_v44 = vand.u32 4294901760, %v192_v38  ;;  %v200_v45 = vand.u32 4294901760, %v199_v39  ;;  %p994_p11 = por %p993_p10, %p992_p9 }
  0x1c   :  { %857 = vmatprep.subr.bf16.mxu1 %v1057_v14  ;;  %v174_v32 = vand.u32 4294901760, %v173_v27  ;;  %v1073_v35 = vpack.c.bf16 %v186_v34, %v179_v33  ;;  %v180_v36 = vsub.f32 %v178_v28, %v179_v33  ;;  %v187_v37 = vsub.f32 %v185_v29, %v186_v34 }
  0x1d   :  { %v167_v31 = vand.u32 4294901760, %v166_v26  ;;  %v206_v47 = vsub.f32 %v60_v17, %v88_v21  ;;  %v213_v48 = vsub.f32 %v61_v18, %v91_v22  ;;  %v924_v49 = vpack.c.bf16 %v200_v45, %v193_v44  ;;  %p995_p12 = pnand %p994_p11, %p988_p8 }
  0x1e   :  { %907 = vmatpush3.bf16.msra.mxu0 %v1057_v14  ;;  %v181_v42 = vand.u32 4294901760, %v180_v36  ;;  %v188_v43 = vand.u32 4294901760, %v187_v37  ;;  %v194_v50 = vsub.f32 %v192_v38, %v193_v44  ;;  %v201_v51 = vsub.f32 %v199_v39, %v200_v45 }
  0x1f   :  { %859 = vmatpush3.bf16.msra.mxu1 %v1057_v14  ;;  %909 = vmatprep.subr.bf16.mxu0 %v1065_v25  ;;  %v868_v41 = vpack.c.bf16 %v174_v32, %v167_v31  ;;  %v207_v52 = vand.u32 4294901760, %v206_v47  ;;  %v214_v53 = vand.u32 4294901760, %v213_v48  ;;  %v884_v63 = vpack.c.bf16 %v171_v20, %v164_v19 }
  0x20   :  { %861 = vmatprep.subr.bf16.mxu1 %v1065_v25  ;;  %v872_v46 = vpack.c.bf16 %v188_v43, %v181_v42  ;;  %v195_v54 = vand.u32 4294901760, %v194_v50  ;;  %v202_v55 = vand.u32 4294901760, %v201_v51  ;;  %v888_v0 = vpack.c.bf16 %v185_v29, %v178_v28 }
  0x21   :  { %v928_v56 = vpack.c.bf16 %v214_v53, %v207_v52  ;;  %v208_v57 = vsub.f32 %v206_v47, %v207_v52  ;;  %v215_v58 = vsub.f32 %v213_v48, %v214_v53  ;;  %v892_v1 = vpack.c.bf16 %v199_v39, %v192_v38 }
  0x22   :  { %911 = vmatpush3.bf16.msra.mxu0 %v1065_v25  ;;  %v876_v59 = vpack.c.bf16 %v202_v55, %v195_v54  ;;  %v896_v2 = vpack.c.bf16 %v213_v48, %v206_v47  ;;  %v39_v4 = vand.u32 127, %v38_v3  ;;  %v1017_v6 = vmov 0.0  }
  0x23   :  { %863 = vmatpush3.bf16.msra.mxu1 %v1065_v25  ;;  %913 = vmatprep.subr.bf16.mxu0 %v1069_v30  ;;  %v209_v60 = vand.u32 4294901760, %v208_v57  ;;  %v216_v61 = vand.u32 4294901760, %v215_v58 }
  0x24   :  { %865 = vmatprep.subr.bf16.mxu1 %v1069_v30 }
  0x25   :  { %v880_v62 = vpack.c.bf16 %v216_v61, %v209_v60 }
  0x26   :  { %915 = vmatpush3.bf16.msra.mxu0 %v1069_v30 }
  0x27   :  { %867 = vmatpush3.bf16.msra.mxu1 %v1069_v30  ;;  %917 = vmatprep.subr.bf16.mxu0 %v916_v40 }
  0x28   :  { %869 = vmatprep.subr.bf16.mxu1 %v868_v41 }
  0x94   :  { %v42_v5 = vpop.permute.xlu0 %41 }
  0x95   :  { %vm46_vm1 = vcmp.eq.s32.totalorder %v42_v5, %v39_v4 }
  0x96   :  { %v670_v7 = vsel %vm46_vm1, 1.0, %v1017_v6 }
  0x97   :  { %v64_v8 = vsel %vm62_vm0, %v670_v7, 0 }
  0x98   :  { %v143_v9 = vsub.f32 %v64_v8, %v64_v8  ;;  %v45_v10 = vpop.permute.xlu0 %44 }
  0x99   :  { %vm47_vm2 = vcmp.eq.s32.totalorder %v45_v10, %v39_v4 }
  0x9a   :  { %v671_v11 = vsel %vm47_vm2, 1.0, %v1017_v6  ;;  %v144_v12 = vand.u32 4294901760, %v143_v9 }
  0x9b   :  { %v67_v15 = vsel %vm62_vm0, %v671_v11, 0 }
  0x9c   :  { %v153_v16 = vsub.f32 %v67_v15, %v67_v15  ;;  %811 = vmatprep.mubr.f32.mxu0 %v144_v12  ;;  %v145_v17 = vsub.f32 %v143_v9, %v144_v12 }
  0x9e   :  { %v146_v18 = vand.u32 4294901760, %v145_v17  ;;  %v154_v19 = vand.u32 4294901760, %v153_v16 }
  0xa0   :  { %754 = vmatprep.mubr.f32.mxu1 %v146_v18  ;;  %812 = vmatmul.mubr.f32.vlgmr.msra.gmra.mrb[0].mxu0 %v154_v19  ;;  %v155_v20 = vsub.f32 %v153_v16, %v154_v19 }
  0xa1   :  { %919 = vmatpush3.bf16.msra.mxu0 %v916_v40  ;;  %830 = vmatprep.mubr.msk.f32.mxu0 %vm62_vm0, %v670_v7 }
  0xa2   :  { %921 = vmatprep.subr.bf16.mxu0 %v1073_v35  ;;  %v156_v21 = vand.u32 4294901760, %v155_v20 }
  0xa4   :  { %755 = vmatmul.mubr.f32.vlgmr.msra.gmra.mrb[0].mxu1 %v156_v21 }
  0xa5   :  { %871 = vmatpush3.bf16.msra.mxu1 %v868_v41  ;;  %923 = vmatpush3.bf16.msra.mxu0 %v1073_v35 }
  0xa6   :  { %773 = vmatprep.mubr.msk.f32.mxu1 %vm62_vm0, %v670_v7  ;;  %873 = vmatprep.subr.bf16.mxu1 %v872_v46 }
  0xa7   :  { %925 = vmatprep.subr.bf16.mxu0 %v924_v49 }
  0xa9   :  { %875 = vmatpush3.bf16.msra.mxu1 %v872_v46  ;;  %927 = vmatpush3.bf16.msra.mxu0 %v924_v49 }
  0xaa   :  { %877 = vmatprep.subr.bf16.mxu1 %v876_v59  ;;  %929 = vmatprep.subr.bf16.mxu0 %v928_v56 }
  0xad   :  { %879 = vmatpush3.bf16.msra.mxu1 %v876_v59  ;;  %931 = vmatpush3.bf16.msra.mxu0 %v928_v56 }
  0xae   :  { %881 = vmatprep.subr.bf16.mxu1 %v880_v62  ;;  %933 = vmatprep.subr.bf16.mxu0 %v1055_v13 }
  0xb0   :  { %831 = vmatmul.mubr.msk.f32.vlgmr.msra.gmra.mrb[0].mxu0 %vm62_vm0, %v671_v11 }
  0xb1   :  { %883 = vmatpush3.bf16.msra.mxu1 %v880_v62  ;;  %935 = vmatpush3.bf16.msra.mxu0 %v1055_v13 }
  0xb2   :  { %849 = vmatprep.mubr.msk.f32.mxu0 %vm62_vm0, %v670_v7  ;;  %885 = vmatprep.subr.bf16.mxu1 %v884_v63 }
  0xb3   :  { %937 = vmatprep.subr.bf16.mxu0 %v1057_v14 }
  0xb4   :  { %774 = vmatmul.mubr.msk.f32.vlgmr.msra.gmra.mrb[0].mxu1 %vm62_vm0, %v671_v11 }
  0xb5   :  { %887 = vmatpush3.bf16.msra.mxu1 %v884_v63  ;;  %792 = vmatprep.mubr.f32.mxu1 %v143_v9 }
  0xb6   :  { %939 = vmatpush3.bf16.msra.mxu0 %v1057_v14  ;;  %889 = vmatprep.subr.bf16.mxu1 %v888_v0 }
  0xb7   :  { %941 = vmatprep.subr.bf16.mxu0 %v1065_v25 }
  0xb9   :  { %891 = vmatpush3.bf16.msra.mxu1 %v888_v0 }
  0xba   :  { %943 = vmatpush3.bf16.msra.mxu0 %v1065_v25  ;;  %893 = vmatprep.subr.bf16.mxu1 %v892_v1 }
  0xbb   :  { %945 = vmatprep.subr.bf16.mxu0 %v1069_v30 }
  0xbd   :  { %895 = vmatpush3.bf16.msra.mxu1 %v892_v1 }
  0xbe   :  { %947 = vmatpush3.bf16.msra.mxu0 %v1069_v30  ;;  %897 = vmatprep.subr.bf16.mxu1 %v896_v2 }
  0xc1   :  { %850 = vmatmul.mubr.msk.f32.vlgmr.msra.gmra.mrb[0].mxu0 %vm62_vm0, %v671_v11  ;;  %899 = vmatpush3.bf16.msra.mxu1 %v896_v2 }
  0xc4   :  { %793 = vmatmul.mubr.f32.vlgmr.msra.gmra.mrb[0].mxu1 %v153_v16 }
 0x194   :  { %v851_v13 = vpop.f32.mrb[0].mxu0 }
 0x195   :  { %v639_v22 = vpop.f32.mrb[1].mxu0 }
 0x197   :  { %v794_v14 = vpop.f32.mrb[0].mxu1 }
 0x198   :  { %v948_v23 = vadd.f32 %v851_v13, %v794_v14  ;;  %v363_v24 = vpop.f32.mrb[1].mxu1 }
 0x199   :  { %v949_v26 = vadd.f32 %v639_v22, %v363_v24 }
 0x19a   :  { %652 = vst [vmem:[#allocation5 + $0x8] sm:$0xff] %v948_v23 }
 0x19b   :  { %651 = vst [vmem:[#allocation5] sm:$0xff] %v949_v26 }
 0x19c   :  { %998 = shalt.err (!%p995_p12)
}
 0x19d   :  { %s999_s30 = scalar_lea.hbm %s1116_s2, 256 }
 0x19e   :  { %p1000_p13 = scmp.ne.s32.totalorder %s1116_s2, %s999_s30  ;;  %p1003_p0 = scmp.lt.u32.totalorder %s999_s30, %s1116_s2 }
 0x1a0   :  { %p1005_p1 = pnand %p1003_p0, %p1000_p13 }
 0x1a2   :  { %1008 = shalt.err (!%p1005_p1)
}
 0x1a3   :  { %664 = dma.vmem_to_hbm [thread:$0]  %s659_s1, 256, %s1116_s2, [#allocation4], %s1014_s19, %s1014_s19, %s1015_s20  }
 0x1a4   :  { %1011 = dma.done.wait [#allocation4], 256  }
 0x1a5   :  { %1012 = vsyncadd [#allocation4], 4294967040 }
 0x1a6   :  { %668 = vsyncpa [#allocation3], 1 }
 0x1a7   :  { %669 = vsyncpa [#allocation4], 1 }

</bundles_post_ra>
